<compile_context>
chip_gen: v7x
topology: tpu7x:2x2x1
jax: 0.10.0
libtpu: 0.0.40
codegen_flags: <defaults>
</compile_context>

<pallas_src>
from functools import partial

import jax
import jax.numpy as jnp
from jax.experimental import pallas as pl
from jax.experimental.pallas import tpu as pltpu

C = 3          # number of classes / features
TILE_B = 128   # batch-tile width (lane axis); raise for large batches


def _ce_train_kernel(w_ref, b_ref, d_ref, o_ref):
    """One batch tile of TILE_B samples.

    w_ref: SMEM (3, 3) f32   -- Linear weight W (W[c, k])
    b_ref: SMEM (3,)   f32   -- Linear bias
    d_ref: VMEM (8, TILE_B) f32
             rows 0..2 = x^T  (feature k of every sample, lane-dense)
             rows 3..5 = y^T  (target prob of class c, lane-dense; 0 on pad lanes)
             rows 6..7 unused
    o_ref: VMEM (1, TILE_B) f32  -- per-sample loss (lane-dense)
    """
    x0 = d_ref[0:1, :]
    x1 = d_ref[1:2, :]
    x2 = d_ref[2:3, :]
    y0 = d_ref[3:4, :]
    y1 = d_ref[4:5, :]
    y2 = d_ref[5:6, :]

    # ---- linear: z_c = b[c] + sum_k W[c,k] * x_k  (3 unrolled scalar*vector madds) ----
    z0 = b_ref[0] + w_ref[0, 0] * x0 + w_ref[0, 1] * x1 + w_ref[0, 2] * x2
    z1 = b_ref[1] + w_ref[1, 0] * x0 + w_ref[1, 1] * x1 + w_ref[1, 2] * x2
    z2 = b_ref[2] + w_ref[2, 0] * x0 + w_ref[2, 1] * x1 + w_ref[2, 2] * x2

    # ---- softmax over the 3 classes (per lane / per sample) ----
    m = jnp.maximum(jnp.maximum(z0, z1), z2)
    e0 = jnp.exp(z0 - m)
    e1 = jnp.exp(z1 - m)
    e2 = jnp.exp(z2 - m)
    s = e0 + e1 + e2
    inv = pl.reciprocal(s, approx=True)       # EUP vrcp
    inv = inv * (2.0 - s * inv)                # one Newton step -> ~f32 accuracy
    p0 = e0 * inv
    p1 = e1 * inv
    p2 = e2 * inv

    # ---- CrossEntropyLoss on the softmax output: -sum_c y_c * log_softmax(p)_c ----
    # p in [0, 1] so no max-subtraction pass is needed.
    q0 = jnp.exp(p0)
    q1 = jnp.exp(p1)
    q2 = jnp.exp(p2)
    log_s2 = jnp.log(q0 + q1 + q2)
    loss = -(y0 * (p0 - log_s2) + y1 * (p1 - log_s2) + y2 * (p2 - log_s2))

    o_ref[...] = loss                          # full-width unmasked store


def _pack(x, y, b_pad):
    """Pack x (B,3) and y (B,3) into one (8, b_pad) f32 block (fused under jit)."""
    B = x.shape[0]
    d = jnp.zeros((8, b_pad), jnp.float32)
    d = d.at[0:C, 0:B].set(x.T.astype(jnp.float32))
    d = d.at[C:2 * C, 0:B].set(y.T.astype(jnp.float32))
    return d


@jax.jit
def simple_train_loss_batched(x, y, W, b):
    """x: (B,3) f32, y: (B,3) f32 probs, W: (3,3), b: (3,) -> (B,) f32 losses."""
    B = x.shape[0]
    b_pad = ((B + TILE_B - 1) // TILE_B) * TILE_B
    data = _pack(x, y, b_pad)
    out = pl.pallas_call(
        _ce_train_kernel,
        out_shape=jax.ShapeDtypeStruct((1, b_pad), jnp.float32),
        grid=(b_pad // TILE_B,),
        in_specs=[
            pl.BlockSpec(memory_space=pltpu.MemorySpace.SMEM),   # W scalars
            pl.BlockSpec(memory_space=pltpu.MemorySpace.SMEM),   # bias scalars
            pl.BlockSpec((8, TILE_B), lambda i: (0, i)),          # packed x/y tile
        ],
        out_specs=pl.BlockSpec((1, TILE_B), lambda i: (0, i)),    # lane-dense loss
        compiler_params=pltpu.CompilerParams(
            dimension_semantics=("parallel",)),
    )(W.astype(jnp.float32), b.astype(jnp.float32), data)
    return out[0, :B]


def simple_train_loss(x, y, W, b):
    """Single-sample module semantics: x (3,), y (3,) -> scalar loss."""
    return simple_train_loss_batched(x[None, :], y[None, :], W, b)[0]


def _reference_loss_batched(x, y, W, b):
    z = x @ W.T + b
    p = jax.nn.softmax(z, axis=-1)
    logp = jax.nn.log_softmax(p, axis=-1)
    return -jnp.sum(y * logp, axis=-1)


if __name__ == "__main__":
    key = jax.random.PRNGKey(0)
    kx, kw, kb, kxb, kyb = jax.random.split(key, 5)

    # nn.Linear(3,3)-style uniform(-1/sqrt(3), 1/sqrt(3)) init (deterministic).
    bound = 1.0 / jnp.sqrt(3.0)
    W = jax.random.uniform(kw, (C, C), jnp.float32, -bound, bound)
    b = jax.random.uniform(kb, (C,), jnp.float32, -bound, bound)

    # --- single-sample case (the module's example inputs: randn(3), y = [1,0,0]) ---
    x1 = jax.random.normal(kx, (C,), jnp.float32)
    y1 = jnp.array([1.0, 0.0, 0.0], jnp.float32)
    loss1 = simple_train_loss(x1, y1, W, b)
    jax.block_until_ready(loss1)
    ref1 = _reference_loss_batched(x1[None, :], y1[None, :], W, b)[0]
    assert jnp.allclose(loss1, ref1, atol=1e-5, rtol=1e-5), (loss1, ref1)

    # --- batched case: 8 samples in one pallas_call (samples on the lane axis) ---
    B = 8
    xb = jax.random.normal(kxb, (B, C), jnp.float32)
    yb = jax.nn.softmax(jax.random.normal(kyb, (B, C), jnp.float32), axis=-1)
    lossb = simple_train_loss_batched(xb, yb, W, b)
    jax.block_until_ready(lossb)
    refb = _reference_loss_batched(xb, yb, W, b)
    assert jnp.allclose(lossb, refb, atol=1e-5, rtol=1e-5), (lossb, refb)

    print("KERNEL_OK")
</pallas_src>

<mosaic_0001>
module attributes {stable_mosaic.version = 11 : i64} {
  func.func @_ce_train_kernel(%arg0: i32, %arg1: memref<3x3xf32, #tpu.memory_space<smem>>, %arg2: memref<3xf32, #tpu.memory_space<smem>>, %arg3: memref<8x128xf32, #tpu.memory_space<vmem>>, %arg4: memref<1x128xf32, #tpu.memory_space<vmem>>) attributes {dimension_semantics = [#tpu.dimension_semantics<parallel>], iteration_bounds = array<i64: 1>, scalar_prefetch = 0 : i64, scratch_operands = 0 : i64, tpu.core_type = #tpu.core_type<tc>, window_params = [{transform_indices = @transform_0, window_bounds = array<i64: 3, 3>}, {transform_indices = @transform_1, window_bounds = array<i64: 3>}, {transform_indices = @transform_2, window_bounds = array<i64: 8, 128>}, {transform_indices = @transform_3, window_bounds = array<i64: 1, 128>}]} {
    %c0 = arith.constant 0 : index
    %c0_0 = arith.constant 0 : index
    %0 = vector.load %arg3[%c0, %c0_0] : memref<8x128xf32, #tpu.memory_space<vmem>>, vector<1x128xf32>
    %c1 = arith.constant 1 : index
    %c0_1 = arith.constant 0 : index
    %1 = vector.load %arg3[%c1, %c0_1] : memref<8x128xf32, #tpu.memory_space<vmem>>, vector<1x128xf32>
    %c2 = arith.constant 2 : index
    %c0_2 = arith.constant 0 : index
    %2 = vector.load %arg3[%c2, %c0_2] : memref<8x128xf32, #tpu.memory_space<vmem>>, vector<1x128xf32>
    %c3 = arith.constant 3 : index
    %c0_3 = arith.constant 0 : index
    %3 = vector.load %arg3[%c3, %c0_3] : memref<8x128xf32, #tpu.memory_space<vmem>>, vector<1x128xf32>
    %c4 = arith.constant 4 : index
    %c0_4 = arith.constant 0 : index
    %4 = vector.load %arg3[%c4, %c0_4] : memref<8x128xf32, #tpu.memory_space<vmem>>, vector<1x128xf32>
    %c5 = arith.constant 5 : index
    %c0_5 = arith.constant 0 : index
    %5 = vector.load %arg3[%c5, %c0_5] : memref<8x128xf32, #tpu.memory_space<vmem>>, vector<1x128xf32>
    %c0_6 = arith.constant 0 : index
    %6 = memref.load %arg2[%c0_6] : memref<3xf32, #tpu.memory_space<smem>>
    %c0_7 = arith.constant 0 : index
    %c0_8 = arith.constant 0 : index
    %7 = memref.load %arg1[%c0_7, %c0_8] : memref<3x3xf32, #tpu.memory_space<smem>>
    %8 = vector.broadcast %7 : f32 to vector<1x128xf32>
    %9 = arith.mulf %8, %0 : vector<1x128xf32>
    %10 = vector.broadcast %6 : f32 to vector<1x128xf32>
    %11 = arith.addf %10, %9 : vector<1x128xf32>
    %c0_9 = arith.constant 0 : index
    %c1_10 = arith.constant 1 : index
    %12 = memref.load %arg1[%c0_9, %c1_10] : memref<3x3xf32, #tpu.memory_space<smem>>
    %13 = vector.broadcast %12 : f32 to vector<1x128xf32>
    %14 = arith.mulf %13, %1 : vector<1x128xf32>
    %15 = arith.addf %11, %14 : vector<1x128xf32>
    %c0_11 = arith.constant 0 : index
    %c2_12 = arith.constant 2 : index
    %16 = memref.load %arg1[%c0_11, %c2_12] : memref<3x3xf32, #tpu.memory_space<smem>>
    %17 = vector.broadcast %16 : f32 to vector<1x128xf32>
    %18 = arith.mulf %17, %2 : vector<1x128xf32>
    %19 = arith.addf %15, %18 : vector<1x128xf32>
    %c1_13 = arith.constant 1 : index
    %20 = memref.load %arg2[%c1_13] : memref<3xf32, #tpu.memory_space<smem>>
    %c1_14 = arith.constant 1 : index
    %c0_15 = arith.constant 0 : index
    %21 = memref.load %arg1[%c1_14, %c0_15] : memref<3x3xf32, #tpu.memory_space<smem>>
    %22 = vector.broadcast %21 : f32 to vector<1x128xf32>
    %23 = arith.mulf %22, %0 : vector<1x128xf32>
    %24 = vector.broadcast %20 : f32 to vector<1x128xf32>
    %25 = arith.addf %24, %23 : vector<1x128xf32>
    %c1_16 = arith.constant 1 : index
    %c1_17 = arith.constant 1 : index
    %26 = memref.load %arg1[%c1_16, %c1_17] : memref<3x3xf32, #tpu.memory_space<smem>>
    %27 = vector.broadcast %26 : f32 to vector<1x128xf32>
    %28 = arith.mulf %27, %1 : vector<1x128xf32>
    %29 = arith.addf %25, %28 : vector<1x128xf32>
    %c1_18 = arith.constant 1 : index
    %c2_19 = arith.constant 2 : index
    %30 = memref.load %arg1[%c1_18, %c2_19] : memref<3x3xf32, #tpu.memory_space<smem>>
    %31 = vector.broadcast %30 : f32 to vector<1x128xf32>
    %32 = arith.mulf %31, %2 : vector<1x128xf32>
    %33 = arith.addf %29, %32 : vector<1x128xf32>
    %c2_20 = arith.constant 2 : index
    %34 = memref.load %arg2[%c2_20] : memref<3xf32, #tpu.memory_space<smem>>
    %c2_21 = arith.constant 2 : index
    %c0_22 = arith.constant 0 : index
    %35 = memref.load %arg1[%c2_21, %c0_22] : memref<3x3xf32, #tpu.memory_space<smem>>
    %36 = vector.broadcast %35 : f32 to vector<1x128xf32>
    %37 = arith.mulf %36, %0 : vector<1x128xf32>
    %38 = vector.broadcast %34 : f32 to vector<1x128xf32>
    %39 = arith.addf %38, %37 : vector<1x128xf32>
    %c2_23 = arith.constant 2 : index
    %c1_24 = arith.constant 1 : index
    %40 = memref.load %arg1[%c2_23, %c1_24] : memref<3x3xf32, #tpu.memory_space<smem>>
    %41 = vector.broadcast %40 : f32 to vector<1x128xf32>
    %42 = arith.mulf %41, %1 : vector<1x128xf32>
    %43 = arith.addf %39, %42 : vector<1x128xf32>
    %c2_25 = arith.constant 2 : index
    %c2_26 = arith.constant 2 : index
    %44 = memref.load %arg1[%c2_25, %c2_26] : memref<3x3xf32, #tpu.memory_space<smem>>
    %45 = vector.broadcast %44 : f32 to vector<1x128xf32>
    %46 = arith.mulf %45, %2 : vector<1x128xf32>
    %47 = arith.addf %43, %46 : vector<1x128xf32>
    %48 = arith.maximumf %19, %33 : vector<1x128xf32>
    %49 = arith.maximumf %48, %47 : vector<1x128xf32>
    %50 = arith.subf %19, %49 : vector<1x128xf32>
    %51 = math.exp %50 : vector<1x128xf32>
    %52 = arith.subf %33, %49 : vector<1x128xf32>
    %53 = math.exp %52 : vector<1x128xf32>
    %54 = arith.subf %47, %49 : vector<1x128xf32>
    %55 = math.exp %54 : vector<1x128xf32>
    %56 = arith.addf %51, %53 : vector<1x128xf32>
    %57 = arith.addf %56, %55 : vector<1x128xf32>
    %58 = tpu.reciprocal %57 {approx = true} : vector<1x128xf32> -> vector<1x128xf32>
    %59 = arith.mulf %57, %58 : vector<1x128xf32>
    %cst = arith.constant 2.000000e+00 : f32
    %60 = vector.broadcast %cst : f32 to vector<1x128xf32>
    %61 = arith.subf %60, %59 : vector<1x128xf32>
    %62 = arith.mulf %58, %61 : vector<1x128xf32>
    %63 = arith.mulf %51, %62 : vector<1x128xf32>
    %64 = arith.mulf %53, %62 : vector<1x128xf32>
    %65 = arith.mulf %55, %62 : vector<1x128xf32>
    %66 = math.exp %63 : vector<1x128xf32>
    %67 = math.exp %64 : vector<1x128xf32>
    %68 = math.exp %65 : vector<1x128xf32>
    %69 = arith.addf %66, %67 : vector<1x128xf32>
    %70 = arith.addf %69, %68 : vector<1x128xf32>
    %71 = math.log %70 : vector<1x128xf32>
    %72 = arith.subf %63, %71 : vector<1x128xf32>
    %73 = arith.mulf %3, %72 : vector<1x128xf32>
    %74 = arith.subf %64, %71 : vector<1x128xf32>
    %75 = arith.mulf %4, %74 : vector<1x128xf32>
    %76 = arith.addf %73, %75 : vector<1x128xf32>
    %77 = arith.subf %65, %71 : vector<1x128xf32>
    %78 = arith.mulf %5, %77 : vector<1x128xf32>
    %79 = arith.addf %76, %78 : vector<1x128xf32>
    %cst_27 = arith.constant 0.000000e+00 : f32
    %80 = vector.broadcast %cst_27 : f32 to vector<1x128xf32>
    %81 = arith.subf %80, %79 : vector<1x128xf32>
    %c0_28 = arith.constant 0 : index
    %c0_29 = arith.constant 0 : index
    %82 = vector.load %arg4[%c0_28, %c0_29] : memref<1x128xf32, #tpu.memory_space<vmem>>, vector<1x128xf32>
    tpu.vector_store %arg4[%c0_28, %c0_29], %81 {strides = array<i32>} : memref<1x128xf32, #tpu.memory_space<vmem>>, vector<1x128xf32>,
    return
  }
  func.func @transform_0(%arg0: i32) -> (i32, i32) {
    %c0_i32 = arith.constant 0 : i32
    %c0_i32_0 = arith.constant 0 : i32
    %c0_i32_1 = arith.constant 0 : i32
    return %c0_i32, %c0_i32_0 : i32, i32
  }
  func.func @transform_1(%arg0: i32) -> i32 {
    %c0_i32 = arith.constant 0 : i32
    %c0_i32_0 = arith.constant 0 : i32
    return %c0_i32 : i32
  }
  func.func @transform_2(%arg0: i32) -> (i32, i32) {
    %c0_i32 = arith.constant 0 : i32
    %c0_i32_0 = arith.constant 0 : i32
    return %c0_i32, %arg0 : i32, i32
  }
  func.func @transform_3(%arg0: i32) -> (i32, i32) {
    %c0_i32 = arith.constant 0 : i32
    %c0_i32_0 = arith.constant 0 : i32
    return %c0_i32, %arg0 : i32, i32
  }
}

</mosaic_0001>

<bundles_post_ra>
// kernel: simple_train_loss_batched.1
= control target key start
LH: loop header
LB: loop body
LE: loop exit
PB: predicated region body
PF: predicated region fallthrough
CT: control target
= control target key end

     0   :  { %8 = vsyncpa [#allocation4], 0  ;;  %s284_s0 = inlined_call_operand.vmem [shape: f32[3,3], index: 0, kind: input, shape index: {}]   ;;  %s285_s1 = inlined_call_operand.vmem [shape: f32[3], index: 1, kind: input, shape index: {}]   ;;  %s286_s2 = inlined_call_operand.vmem [shape: f32[8,128], index: 2, kind: input, shape index: {}]   ;;  %s287_s3 = inlined_call_operand.hbm [shape: f32[1,128], index: 3, kind: output, shape index: {}]  }
   0x1   :  { %9 = vsyncpa [#allocation6], 0 }
   0x2   :  { %10 = vsyncpa [#allocation3], 0  ;;  %s17_s14 = sshll.u32 %s284_s0, 4  ;;  %s27_s17 = sshll.u32 %s285_s1, 4  ;;  %s18_s14 = int_to_ptr.vmem [resolvable:$true] %s17_s14  ;;  %s28_s17 = int_to_ptr.vmem [resolvable:$true] %s27_s17 }
   0x3   :  { %s173_s18 = scalar_lea.vmem %s18_s14, 64  ;;  %p178_p1 = scmp.lt.s32.totalorder %s18_s14, %s18_s14 }
   0x4   :  { %p174_p0 = scmp.ne.s32.totalorder %s18_s14, %s173_s18  ;;  %p179_p2 = scmp.lt.s32.totalorder %s173_s18, %s173_s18 }
   0x6   :  { %p180_p3 = por %p179_p2, %p178_p1 }
   0x8   :  { %p181_p4 = pnand %p180_p3, %p174_p0 }
   0xa   :  { %184 = shalt.err (!%p181_p4)
}
   0xb   :  { %s225_s19 = smov [#allocation2]   ;;  %s185_s20 = scalar_lea.vmem %s28_s17, 16 }
   0xc   :  { %20 = dma.vmem_to_smem %s18_s14, 64, %s225_s19, [#allocation4]  }
   0xd   :  { %p186_p5 = scmp.ne.s32.totalorder %s28_s17, %s185_s20  ;;  %p190_p6 = scmp.lt.s32.totalorder %s28_s17, %s28_s17 }
   0xe   :  { %p191_p7 = scmp.lt.s32.totalorder %s185_s20, %s185_s20 }
  0x10   :  { %p192_p8 = por %p191_p7, %p190_p6 }
  0x12   :  { %p193_p9 = pnand %p192_p8, %p186_p5 }
  0x14   :  { %196 = shalt.err (!%p193_p9)
}
  0x15   :  { %s226_s0 = smov [#allocation5]  }
  0x16   :  { %30 = dma.vmem_to_smem %s28_s17, 16, %s226_s0, [#allocation6]  }
  0x17   :  { %219 = dma.done.wait [#allocation4], 64  }
  0x18   :  { %220 = vsyncadd [#allocation4], 4294967232 }
  0x19   :  { %221 = dma.done.wait [#allocation6], 16  }
  0x1a   :  { %222 = vsyncadd [#allocation6], 4294967280 }
  0x1b   :  { %39 = sfence }
  0x1c   :  { %s46_s1 = sld [smem:[#allocation5]]  ;;  %s144_s22 = sld [smem:[#allocation2 + $0x1]]  ;;  %v40_v0 = vld [vmem:[%s286_s2] sm:$0x1]  ;;  %v41_v1 = vld [vmem:[%s286_s2 + $0x1] sm:$0x1] }
  0x1d   :  { %s47_s21 = sld [smem:[#allocation2]]  ;;  %s145_s23 = sld [smem:[#allocation2 + $0x2]]  ;;  %v42_v2 = vld [vmem:[%s286_s2 + $0x2] sm:$0x1]  ;;  %v43_v63 = vld [vmem:[%s286_s2 + $0x3] sm:$0x1] }
  0x1e   :  { %s146_s24 = sld [smem:[#allocation5 + $0x1]]  ;;  %s147_s25 = sld [smem:[#allocation2 + $0x80]] }
  0x1f   :  { %s148_s28 = sld [smem:[#allocation2 + $0x81]]  ;;  %s149_s29 = sld [smem:[#allocation2 + $0x82]] }
  0x20   :  { %s150_s5 = sld [smem:[#allocation5 + $0x2]]  ;;  %s151_s6 = sld [smem:[#allocation2 + $0x100]] }
  0x21   :  { %s152_s9 = sld [smem:[#allocation2 + $0x101]]  ;;  %s153_s10 = sld [smem:[#allocation2 + $0x102]] }
  0x22   :  { %v50_v4 = vstv %s46_s1  ;;  %v53_v6 = vstv %s144_s22  ;;  %s227_s17 = smov [#allocation7]  }
  0x23   :  { %v48_v3 = vstv %s47_s21  ;;  %v57_v7 = vstv %s145_s23  ;;  %v54_v8 = vmul.f32 %v53_v6, %v41_v1  ;;  %s134_s18 = sshll.u32 %s227_s17, 4  ;;  %s135_s18 = int_to_ptr.vmem [resolvable:$true] %s134_s18 }
  0x24   :  { %v49_v5 = vmul.f32 %v48_v3, %v40_v0  ;;  %v58_v9 = vmul.f32 %v57_v7, %v42_v2  ;;  %v62_v10 = vstv %s147_s25  ;;  %v64_v11 = vstv %s146_s24  ;;  %s197_s19 = scalar_lea.vmem %s135_s18, 16  ;;  %s201_s20 = scalar_lea.vmem %s135_s18, 32 }
  0x25   :  { %v63_v13 = vmul.f32 %v62_v10, %v40_v0  ;;  %v67_v14 = vstv %s148_s28  ;;  %v71_v15 = vstv %s149_s29  ;;  %p198_p10 = scmp.ne.s32.totalorder %s135_s18, %s197_s19  ;;  %p202_p11 = scmp.lt.s32.totalorder %s135_s18, %s135_s18 }
  0x26   :  { %v51_v12 = vadd.f32 %v50_v4, %v49_v5  ;;  %v68_v16 = vmul.f32 %v67_v14, %v41_v1  ;;  %v72_v17 = vmul.f32 %v71_v15, %v42_v2  ;;  %v76_v18 = vstv %s151_s6  ;;  %p203_p12 = scmp.lt.s32.totalorder %s201_s20, %s197_s19 }
  0x27   :  { %v78_v19 = vstv %s150_s5  ;;  %v65_v21 = vadd.f32 %v64_v11, %v63_v13  ;;  %v77_v22 = vmul.f32 %v76_v18, %v40_v0  ;;  %v81_v23 = vstv %s152_s9  ;;  %v44_v0 = vld [vmem:[%s286_s2 + $0x4] sm:$0x1] }
  0x28   :  { %v55_v20 = vadd.f32 %v54_v8, %v51_v12  ;;  %v82_v24 = vmul.f32 %v81_v23, %v41_v1  ;;  %v85_v25 = vstv %s153_s10  ;;  %v45_v1 = vld [vmem:[%s286_s2 + $0x5] sm:$0x1]  ;;  %p204_p13 = por %p203_p12, %p202_p11 }
  0x29   :  { %v69_v27 = vadd.f32 %v68_v16, %v65_v21  ;;  %v79_v28 = vadd.f32 %v78_v19, %v77_v22  ;;  %v86_v29 = vmul.f32 %v85_v25, %v42_v2 }
  0x2a   :  { %v59_v26 = vadd.f32 %v58_v9, %v55_v20  ;;  %p205_p0 = pnand %p204_p13, %p198_p10 }
  0x2b   :  { %v73_v30 = vadd.f32 %v72_v17, %v69_v27  ;;  %v83_v31 = vadd.f32 %v82_v24, %v79_v28 }
  0x2d   :  { %v87_v32 = vadd.f32 %v86_v29, %v83_v31  ;;  %v88_v33 = vmax.f32 %v59_v26, %v73_v30 }
  0x2f   :  { %v89_v34 = vmax.f32 %v88_v33, %v87_v32 }
  0x31   :  { %v90_v35 = vsub.f32 %v59_v26, %v89_v34  ;;  %v93_v36 = vsub.f32 %v73_v30, %v89_v34  ;;  %v96_v37 = vsub.f32 %v87_v32, %v89_v34 }
  0x33   :  { %v91_v38 = vmul.f32 1.442695, %v90_v35  ;;  %v94_v39 = vmul.f32 1.442695, %v93_v36  ;;  %v97_v40 = vmul.f32 1.442695, %v96_v37 }
  0x35   :  { %157 = vpow2.f32 %v91_v38 }
  0x36   :  { %159 = vpow2.f32 %v94_v39 }
  0x37   :  { %161 = vpow2.f32 %v97_v40 }
  0x3f   :  { %v158_v41 = vpop.eup %157 }
  0x40   :  { %v160_v42 = vpop.eup %159 }
  0x41   :  { %v162_v43 = vpop.eup %161  ;;  %v99_v44 = vadd.f32 %v160_v42, %v158_v41 }
  0x43   :  { %v100_v45 = vadd.f32 %v162_v43, %v99_v44 }
  0x45   :  { %163 = vrcp.f32 %v100_v45 }
  0x4f   :  { %v164_v46 = vpop.eup %163 }
  0x50   :  { %v102_v47 = vmul.f32 %v164_v46, %v100_v45 }
  0x52   :  { %v103_v48 = vsub.f32 2.0, %v102_v47 }
  0x54   :  { %v104_v49 = vmul.f32 %v164_v46, %v103_v48 }
  0x56   :  { %v105_v50 = vmul.f32 %v158_v41, %v104_v49  ;;  %v106_v51 = vmul.f32 %v160_v42, %v104_v49  ;;  %v107_v52 = vmul.f32 %v162_v43, %v104_v49 }
  0x58   :  { %v108_v53 = vmul.f32 1.442695, %v105_v50  ;;  %v110_v54 = vmul.f32 1.442695, %v106_v51  ;;  %v112_v55 = vmul.f32 1.442695, %v107_v52 }
  0x5a   :  { %165 = vpow2.f32 %v108_v53 }
  0x5b   :  { %167 = vpow2.f32 %v110_v54 }
  0x5c   :  { %169 = vpow2.f32 %v112_v55 }
  0x64   :  { %v166_v56 = vpop.eup %165 }
  0x65   :  { %v168_v57 = vpop.eup %167 }
  0x66   :  { %v170_v58 = vpop.eup %169  ;;  %v114_v59 = vadd.f32 %v168_v57, %v166_v56 }
  0x68   :  { %v115_v60 = vadd.f32 %v170_v58, %v114_v59 }
  0x6a   :  { %171 = vlog2.f32 %v115_v60 }
  0x74   :  { %v172_v61 = vpop.eup %171 }
  0x75   :  { %v117_v62 = vmul.f32 0.6931472, %v172_v61 }
  0x77   :  { %v118_v2 = vsub.f32 %v105_v50, %v117_v62  ;;  %v120_v3 = vsub.f32 %v106_v51, %v117_v62  ;;  %v123_v4 = vsub.f32 %v107_v52, %v117_v62 }
  0x79   :  { %v119_v5 = vmul.f32 %v118_v2, %v43_v63  ;;  %v121_v6 = vmul.f32 %v120_v3, %v44_v0  ;;  %v124_v7 = vmul.f32 %v123_v4, %v45_v1 }
  0x7b   :  { %v122_v8 = vadd.f32 %v121_v6, %v119_v5 }
  0x7d   :  { %v125_v9 = vadd.f32 %v124_v7, %v122_v8 }
  0x7f   :  { %v126_v10 = vsub.f32 0.0, %v125_v9 }
  0x81   :  { %127 = vst [vmem:[#allocation7] sm:$0x1] %v126_v10 }
  0x82   :  { %208 = shalt.err (!%p205_p0)
}
  0x83   :  { %s209_s1 = scalar_lea.hbm %s287_s3, 16 }
  0x84   :  { %p210_p1 = scmp.ne.s32.totalorder %s287_s3, %s209_s1  ;;  %p213_p2 = scmp.lt.u32.totalorder %s209_s1, %s287_s3 }
  0x86   :  { %p215_p3 = pnand %p213_p2, %p210_p1 }
  0x88   :  { %218 = shalt.err (!%p215_p3)
}
  0x89   :  { %137 = dma.vmem_to_hbm [thread:$0]  %s135_s18, 16, %s287_s3, [#allocation3]  }
  0x8a   :  { %223 = dma.done.wait [#allocation3], 16  }
  0x8b   :  { %224 = vsyncadd [#allocation3], 4294967280 }
  0x8c   :  { %141 = vsyncpa [#allocation3], 1 }
  0x8d   :  { %142 = vsyncpa [#allocation4], 1 }
  0x8e   :  { %143 = vsyncpa [#allocation6], 1 }

</bundles_post_ra>
